<compile_context>
chip_gen: v6e
topology: v6e:2x2x1
jax: 0.10.0
libtpu: 0.0.40
codegen_flags: <defaults>
</compile_context>

<pallas_src>
import functools

import jax
import jax.numpy as jnp
from jax.experimental import pallas as pl
from jax.experimental.pallas import tpu as pltpu


def _round_up(x: int, m: int) -> int:
    return (x + m - 1) // m * m


def _pad_to(a, shape):
    pads = [(0, s - d) for d, s in zip(a.shape, shape)]
    if any(p for _, p in pads):
        return jnp.pad(a, pads)
    return a


def _vmem_cap_bytes() -> int:
    """Generation-aware cap for vmem_limit_bytes (v5e/v6e: 128 MiB, v7x: 64 MiB)."""
    try:
        cap = int(pltpu.get_tpu_info().vmem_capacity_bytes)
        return max(cap - (16 << 20), 32 << 20)
    except Exception:
        return 48 << 20  # conservative fallback, safe on v7x's 64 MiB


def _default_tanh_dtype():
    """bf16 tanh on v6e/v7x (EUP has a bf16 path); f32 on v5e and older."""
    try:
        kind = jax.devices()[0].device_kind.lower()
    except Exception:
        return jnp.float32
    if any(old in kind for old in ("v2", "v3", "v4", "v5")):
        return jnp.float32
    return jnp.bfloat16


def _resident_spec(shape):
    """BlockSpec for a grid-invariant operand (weights/biases): DMA'd once.

    Single-buffered via pipeline_mode=pl.Buffered(1) when the installed JAX
    supports it (halves resident-weight VMEM); otherwise falls back to the
    default double-buffered spec.
    """
    idx = lambda i: (0, 0)
    try:
        return pl.BlockSpec(shape, idx, pipeline_mode=pl.Buffered(1))
    except Exception:
        return pl.BlockSpec(shape, idx)


def _mlp_kernel(x_ref, w1_ref, b1_ref, w2_ref, b2_ref, o_ref, *,
                compute_dtype, tanh_dtype):
    # Cast the streamed x tile to bf16 in-kernel (no wrapper-side copy pass).
    x = x_ref[...].astype(compute_dtype)
    # hidden pre-activation: MXU matmul (bf16 in, f32 acc) + f32 bias add.
    acc = jnp.dot(x, w1_ref[...], preferred_element_type=jnp.float32) + b1_ref[...]
    # tanh on the EUP: bf16 on v6e/v7x, f32 on v5e (no bf16 EUP there).
    h = jnp.tanh(acc.astype(tanh_dtype))
    # output: second MXU matmul, f32 accumulate + f32 bias.
    y = jnp.dot(h.astype(compute_dtype), w2_ref[...],
                preferred_element_type=jnp.float32) + b2_ref[...]
    o_ref[...] = y.astype(o_ref.dtype)


def prepare_params(w1, b1, w2, b2, *, compute_dtype=jnp.bfloat16):
    """One-time pad + cast of the Net parameters (hoisted out of the call path).

    Layout convention (transposed vs. torch.nn.Linear.weight):
      w1: [n_feature, n_hidden], w2: [n_hidden, n_output]
      b1: [n_hidden] or [1, n_hidden], b2: [n_output] or [1, n_output]
    Hidden/output dims are zero-padded to multiples of 128 (lane-dense stores);
    zero padding is exact for this MLP (tanh(0)=0 meets zero rows of W2).
    Weights are cast to bf16 (MXU inputs); biases stay f32 (f32 epilogue).
    """
    w1 = jnp.asarray(w1)
    w2 = jnp.asarray(w2)
    b1 = jnp.asarray(b1).reshape(1, -1)
    b2 = jnp.asarray(b2).reshape(1, -1)
    f, h = w1.shape
    h2, o = w2.shape
    assert h == h2 and b1.shape[1] == h and b2.shape[1] == o
    h_pad = _round_up(h, 128)
    o_pad = _round_up(o, 128)
    w1_p = _pad_to(w1, (f, h_pad)).astype(compute_dtype)
    b1_p = _pad_to(b1, (1, h_pad)).astype(jnp.float32)
    w2_p = _pad_to(w2, (h_pad, o_pad)).astype(compute_dtype)
    b2_p = _pad_to(b2, (1, o_pad)).astype(jnp.float32)
    return w1_p, b1_p, w2_p, b2_p


def _vmem_estimate(tm, f, h_pad, o_pad, x_itemsize, c_itemsize, o_itemsize,
                   weight_bufs):
    return (
        2 * tm * f * x_itemsize                                    # x tiles (2 bufs)
        + 2 * tm * o_pad * o_itemsize                              # out tiles (2 bufs)
        + weight_bufs * (f * h_pad + h_pad * o_pad) * c_itemsize  # resident W1/W2
        + weight_bufs * (h_pad + o_pad) * 4                        # resident biases
        + tm * h_pad * (4 + c_itemsize)                            # f32 hidden + bf16 copy
        + tm * o_pad * 4                                           # f32 second-matmul acc
    )


@functools.partial(
    jax.jit, static_argnames=("n_output", "tm", "tanh_dtype", "out_dtype"))
def net_forward(x, w1_p, b1_p, w2_p, b2_p, *, n_output, tm=512,
                tanh_dtype=None, out_dtype=jnp.float32):
    """Forward pass of Net. x: [B, F]; params from prepare_params(); -> [B, n_output]."""
    B, F = x.shape
    assert w1_p.shape[0] == F
    h_pad = w1_p.shape[1]
    o_pad = w2_p.shape[1]
    compute_dtype = w1_p.dtype
    if tanh_dtype is None:
        tanh_dtype = _default_tanh_dtype()

    # ---- batch-tile selection -------------------------------------------------
    tm = max(8, min(int(tm), _round_up(B, 8)))
    if B >= 16 and _round_up(B, tm) // tm < 2:
        # >= 2 grid steps so the "parallel" batch axis can feed both v7x TCs
        # (per-step overhead ~0.35us is negligible vs. leaving a core idle).
        tm = _round_up((B + 1) // 2, 8)

    x_itemsize = jnp.dtype(x.dtype).itemsize
    c_itemsize = jnp.dtype(compute_dtype).itemsize
    o_itemsize = jnp.dtype(out_dtype).itemsize
    cap = _vmem_cap_bytes()
    # Shrink TM until tiles + resident weights + the TMxH fused intermediate fit.
    # (For very large H on v7x the next fallback would be a hidden-dim K-loop
    # with an f32 accumulator; not needed at these sizes.)
    while True:
        est = _vmem_estimate(tm, F, h_pad, o_pad, x_itemsize, c_itemsize,
                             o_itemsize, weight_bufs=1)
        if est + (4 << 20) <= cap or tm <= 64:
            break
        tm = max(64, tm // 2)
    vmem_limit = int(min(max(est + (8 << 20), 32 << 20), cap))

    b_pad = _round_up(B, tm)
    x_p = _pad_to(x, (b_pad, F))  # batch-only padding; no dtype cast, no lane pad
    grid = (b_pad // tm,)

    kernel = functools.partial(_mlp_kernel, compute_dtype=compute_dtype,
                               tanh_dtype=tanh_dtype)

    out_padded = pl.pallas_call(
        kernel,
        out_shape=jax.ShapeDtypeStruct((b_pad, o_pad), out_dtype),
        grid=grid,
        in_specs=[
            pl.BlockSpec((tm, F), lambda i: (i, 0)),  # x: streamed native-dtype tiles
            _resident_spec((F, h_pad)),               # W1: VMEM-resident
            _resident_spec((1, h_pad)),               # b1: VMEM-resident
            _resident_spec((h_pad, o_pad)),           # W2: VMEM-resident
            _resident_spec((1, o_pad)),               # b2: VMEM-resident
        ],
        out_specs=pl.BlockSpec((tm, o_pad), lambda i: (i, 0)),
        compiler_params=pltpu.CompilerParams(
            dimension_semantics=("parallel",),
            vmem_limit_bytes=vmem_limit,
        ),
    )(x_p, w1_p, b1_p, w2_p, b2_p)

    return out_padded[:B, :n_output]


def init_net_params(key, n_feature, n_hidden, n_output, dtype=jnp.float32):
    """Deterministic init matching torch.nn.Linear's U(-1/sqrt(fan_in), ...)."""
    k1, k2, k3, k4 = jax.random.split(key, 4)
    bound1 = 1.0 / (n_feature ** 0.5)
    bound2 = 1.0 / (n_hidden ** 0.5)
    w1 = jax.random.uniform(k1, (n_feature, n_hidden), dtype, -bound1, bound1)
    b1 = jax.random.uniform(k2, (n_hidden,), dtype, -bound1, bound1)
    w2 = jax.random.uniform(k3, (n_hidden, n_output), dtype, -bound2, bound2)
    b2 = jax.random.uniform(k4, (n_output,), dtype, -bound2, bound2)
    return w1, b1, w2, b2


def _reference(x, w1, b1, w2, b2):
    """Pure-JAX f32 reference matching the PyTorch module's semantics."""
    h = jnp.tanh(x @ w1 + jnp.asarray(b1).reshape(1, -1))
    return h @ w2 + jnp.asarray(b2).reshape(1, -1)


if __name__ == "__main__":
    key = jax.random.PRNGKey(0)

    # 1) Small shapes matching the original demo (F=16, H=32, O=4, batch=8).
    n_feature, n_hidden, n_output = 16, 32, 4
    batch = 8
    kx, kp, kx2, kp2 = jax.random.split(key, 4)
    x = jax.random.normal(kx, (batch, n_feature), jnp.float32)
    w1, b1, w2, b2 = init_net_params(kp, n_feature, n_hidden, n_output)
    params = prepare_params(w1, b1, w2, b2)          # one-time pad + bf16 cast

    out = jax.block_until_ready(net_forward(x, *params, n_output=n_output))
    ref = _reference(x, w1, b1, w2, b2)
    assert out.shape == (batch, n_output)
    assert out.dtype == jnp.float32
    assert jnp.allclose(out, ref, atol=2e-2, rtol=2e-2)

    # 2) Larger shapes exercising the multi-tile batch grid + resident weights.
    B2, F2, H2, O2 = 1024, 256, 512, 128
    x2 = jax.random.normal(kx2, (B2, F2), jnp.float32)
    w1b, b1b, w2b, b2b = init_net_params(kp2, F2, H2, O2)
    params2 = prepare_params(w1b, b1b, w2b, b2b)

    out2 = jax.block_until_ready(net_forward(x2, *params2, n_output=O2))
    ref2 = _reference(x2, w1b, b1b, w2b, b2b)
    assert out2.shape == (B2, O2)
    assert jnp.allclose(out2, ref2, atol=6e-2, rtol=6e-2)

    print("KERNEL_OK")
</pallas_src>

<mosaic_0001>
module attributes {stable_mosaic.version = 11 : i64} {
  func.func @_mlp_kernel(%arg0: i32, %arg1: memref<8x16xf32, #tpu.memory_space<vmem>>, %arg2: memref<16x128xbf16, #tpu.memory_space<vmem>>, %arg3: memref<1x128xf32, #tpu.memory_space<vmem>>, %arg4: memref<128x128xbf16, #tpu.memory_space<vmem>>, %arg5: memref<1x128xf32, #tpu.memory_space<vmem>>, %arg6: memref<8x128xf32, #tpu.memory_space<vmem>>) attributes {dimension_semantics = [#tpu.dimension_semantics<parallel>], iteration_bounds = array<i64: 1>, scalar_prefetch = 0 : i64, scratch_operands = 0 : i64, tpu.core_type = #tpu.core_type<tc>, window_params = [{transform_indices = @transform_0, window_bounds = array<i64: 8, 16>}, {pipeline_mode = #tpu.pipeline_mode<synchronous>, transform_indices = @transform_1, window_bounds = array<i64: 16, 128>}, {pipeline_mode = #tpu.pipeline_mode<synchronous>, transform_indices = @transform_2, window_bounds = array<i64: 1, 128>}, {pipeline_mode = #tpu.pipeline_mode<synchronous>, transform_indices = @transform_3, window_bounds = array<i64: 128, 128>}, {pipeline_mode = #tpu.pipeline_mode<synchronous>, transform_indices = @transform_4, window_bounds = array<i64: 1, 128>}, {transform_indices = @transform_5, window_bounds = array<i64: 8, 128>}]} {
    %c0 = arith.constant 0 : index
    %c0_0 = arith.constant 0 : index
    %0 = vector.load %arg1[%c0, %c0_0] : memref<8x16xf32, #tpu.memory_space<vmem>>, vector<8x16xf32>
    %1 = arith.truncf %0 : vector<8x16xf32> to vector<8x16xbf16>
    %c0_1 = arith.constant 0 : index
    %c0_2 = arith.constant 0 : index
    %2 = vector.load %arg2[%c0_1, %c0_2] : memref<16x128xbf16, #tpu.memory_space<vmem>>, vector<16x128xbf16>
    %cst = arith.constant dense<0.000000e+00> : vector<8x128xf32>
    %3 = tpu.matmul %1, %2, %cst {dimension_numbers = #tpu.dot_dimension_numbers<[1], [0], [0], [1], [0, 0, 1, 1], [], []>} : vector<8x16xbf16>, vector<16x128xbf16>, vector<8x128xf32> -> vector<8x128xf32>
    %c0_3 = arith.constant 0 : index
    %c0_4 = arith.constant 0 : index
    %4 = vector.load %arg3[%c0_3, %c0_4] : memref<1x128xf32, #tpu.memory_space<vmem>>, vector<1x128xf32>
    %5 = vector.broadcast %4 : vector<1x128xf32> to vector<8x128xf32>
    %6 = arith.addf %3, %5 : vector<8x128xf32>
    %7 = arith.truncf %6 : vector<8x128xf32> to vector<8x128xbf16>
    %8 = math.tanh %7 : vector<8x128xbf16>
    %c0_5 = arith.constant 0 : index
    %c0_6 = arith.constant 0 : index
    %9 = vector.load %arg4[%c0_5, %c0_6] : memref<128x128xbf16, #tpu.memory_space<vmem>>, vector<128x128xbf16>
    %cst_7 = arith.constant dense<0.000000e+00> : vector<8x128xf32>
    %10 = tpu.matmul %8, %9, %cst_7 {dimension_numbers = #tpu.dot_dimension_numbers<[1], [0], [0], [1], [0, 0, 1, 1], [], []>} : vector<8x128xbf16>, vector<128x128xbf16>, vector<8x128xf32> -> vector<8x128xf32>
    %c0_8 = arith.constant 0 : index
    %c0_9 = arith.constant 0 : index
    %11 = vector.load %arg5[%c0_8, %c0_9] : memref<1x128xf32, #tpu.memory_space<vmem>>, vector<1x128xf32>
    %12 = vector.broadcast %11 : vector<1x128xf32> to vector<8x128xf32>
    %13 = arith.addf %10, %12 : vector<8x128xf32>
    %c0_10 = arith.constant 0 : index
    %c0_11 = arith.constant 0 : index
    %14 = vector.load %arg6[%c0_10, %c0_11] : memref<8x128xf32, #tpu.memory_space<vmem>>, vector<8x128xf32>
    tpu.vector_store %arg6[%c0_10, %c0_11], %13 {strides = array<i32>} : memref<8x128xf32, #tpu.memory_space<vmem>>, vector<8x128xf32>,
    return
  }
  func.func @transform_0(%arg0: i32) -> (i32, i32) {
    %c0_i32 = arith.constant 0 : i32
    %c0_i32_0 = arith.constant 0 : i32
    return %arg0, %c0_i32 : i32, i32
  }
  func.func @transform_1(%arg0: i32) -> (i32, i32) {
    %c0_i32 = arith.constant 0 : i32
    %c0_i32_0 = arith.constant 0 : i32
    %c0_i32_1 = arith.constant 0 : i32
    return %c0_i32, %c0_i32_0 : i32, i32
  }
  func.func @transform_2(%arg0: i32) -> (i32, i32) {
    %c0_i32 = arith.constant 0 : i32
    %c0_i32_0 = arith.constant 0 : i32
    %c0_i32_1 = arith.constant 0 : i32
    return %c0_i32, %c0_i32_0 : i32, i32
  }
  func.func @transform_3(%arg0: i32) -> (i32, i32) {
    %c0_i32 = arith.constant 0 : i32
    %c0_i32_0 = arith.constant 0 : i32
    %c0_i32_1 = arith.constant 0 : i32
    return %c0_i32, %c0_i32_0 : i32, i32
  }
  func.func @transform_4(%arg0: i32) -> (i32, i32) {
    %c0_i32 = arith.constant 0 : i32
    %c0_i32_0 = arith.constant 0 : i32
    %c0_i32_1 = arith.constant 0 : i32
    return %c0_i32, %c0_i32_0 : i32, i32
  }
  func.func @transform_5(%arg0: i32) -> (i32, i32) {
    %c0_i32 = arith.constant 0 : i32
    %c0_i32_0 = arith.constant 0 : i32
    return %arg0, %c0_i32 : i32, i32
  }
}

</mosaic_0001>

<bundles_post_ra>
// kernel: net_forward.1
= control target key start
LH: loop header
LB: loop body
LE: loop exit
PB: predicated region body
PF: predicated region fallthrough
CT: control target
= control target key end

     0   :  { %10 = vsyncpa [#allocation3], 0  ;;  %s427_s0 = inlined_call_operand.hbm [shape: f32[8,16], index: 0, kind: input, shape index: {}]   ;;  %s428_s1 = inlined_call_operand.hbm [shape: bf16[16,128], index: 1, kind: input, shape index: {}]   ;;  %s429_s2 = inlined_call_operand.vmem [shape: f32[1,128], index: 2, kind: input, shape index: {}]   ;;  %s430_s3 = inlined_call_operand.hbm [shape: bf16[128,128], index: 3, kind: input, shape index: {}]   ;;  %s431_s4 = inlined_call_operand.vmem [shape: f32[1,128], index: 4, kind: input, shape index: {}]   ;;  %s432_s5 = inlined_call_operand.vmem [shape: f32[8,128], index: 5, kind: output, shape index: {}]  }
   0x1   :  { %11 = vsyncpa [#allocation5], 0  ;;  %s372_s18 = smov [#allocation4]  }
   0x2   :  { %s27_s19 = sshll.u32 %s372_s18, 4  ;;  %s28_s19 = int_to_ptr.vmem [resolvable:$true] %s27_s19 }
   0x3   :  { %s316_s20 = scalar_lea.vmem %s28_s19, 128  ;;  %p321_p1 = scmp.lt.s32.totalorder %s28_s19, %s28_s19 }
   0x4   :  { %p317_p0 = scmp.ne.s32.totalorder %s28_s19, %s316_s20  ;;  %p322_p2 = scmp.lt.s32.totalorder %s316_s20, %s316_s20 }
   0x6   :  { %p323_p3 = por %p322_p2, %p321_p1 }
   0x8   :  { %p324_p4 = pnand %p323_p3, %p317_p0 }
   0xa   :  { %327 = shalt.err (!%p324_p4)
}
   0xb   :  { %s373_s21 = smov 64   ;;  %s374_s22 = smov 4  }
   0xc   :  { %33 = dma.hbm_to_vmem [thread:$0]  %s428_s1, 128, %s28_s19, [#allocation5], %s373_s21, %s373_s21, %s374_s22  }
   0xd   :  { %s375_s25 = smov [#allocation2]   ;;  %s376_s27 = smov [#allocation6]  }
   0xe   :  { %s18_s26 = sshll.u32 %s375_s25, 4  ;;  %s41_s28 = sshll.u32 %s376_s27, 4  ;;  %s19_s26 = int_to_ptr.vmem [resolvable:$true] %s18_s26  ;;  %s42_s28 = int_to_ptr.vmem [resolvable:$true] %s41_s28 }
   0xf   :  { %s336_s29 = scalar_lea.vmem %s19_s26, 128  ;;  %p341_p6 = scmp.lt.s32.totalorder %s19_s26, %s19_s26 }
  0x10   :  { %p337_p5 = scmp.ne.s32.totalorder %s19_s26, %s336_s29  ;;  %p342_p7 = scmp.lt.s32.totalorder %s336_s29, %s336_s29 }
  0x12   :  { %p343_p8 = por %p342_p7, %p341_p6 }
  0x14   :  { %p344_p9 = pnand %p343_p8, %p337_p5 }
  0x16   :  { %347 = shalt.err (!%p344_p9)
}
  0x17   :  { %21 = dma.hbm_to_vmem [thread:$0]  %s427_s0, 128, %s19_s26, [#allocation3]  }
  0x18   :  { %s356_s7 = scalar_lea.vmem %s42_s28, 1024  ;;  %p361_p11 = scmp.lt.s32.totalorder %s42_s28, %s42_s28 }
  0x19   :  { %p357_p10 = scmp.ne.s32.totalorder %s42_s28, %s356_s7  ;;  %p362_p12 = scmp.lt.s32.totalorder %s356_s7, %s356_s7 }
  0x1b   :  { %p363_p13 = por %p362_p12, %p361_p11 }
  0x1d   :  { %p364_p0 = pnand %p363_p13, %p357_p10 }
  0x1f   :  { %367 = shalt.err (!%p364_p0)
}
  0x20   :  { %47 = dma.hbm_to_vmem [thread:$0]  %s430_s3, 1024, %s42_s28, [#allocation5], %s373_s21, %s373_s21, %s374_s22  }
  0x21   :  { %368 = dma.done.wait [#allocation3], 128  }
  0x22   :  { %369 = vsyncadd [#allocation3], 4294967168 }
  0x23   :  { %370 = dma.done.wait [#allocation5], 1152  }
  0x24   :  { %371 = vsyncadd [#allocation5], 4294966144  ;;  %v377_v0 = vmov 0.0   ;;  %vm378_vm0 = vmmov 0   ;;  %v297_v1 = vld [vmem:[#allocation4] sm:$0xff]   ;;  %v60_v2 = vld [vmem:[#allocation2] sm:$0xff] }
  0x25   :  { %264 = vmatprep.subr.bf16.mxu0 %v377_v0  ;;  %266 = vmatprep.mubr.msk.bf16.mxu0 %vm378_vm0, %v377_v0  ;;  %v61_v3 = vpack.c.bf16 %v60_v2, %v60_v2  ;;  %vm77_vm1 = vcmask 130048   ;;  %v298_v4 = vld [vmem:[#allocation6 + $0x38] sm:$0xff]   ;;  %v299_v5 = vld [vmem:[#allocation6 + $0x30] sm:$0xff]   ;;  %v300_v6 = vld [vmem:[#allocation6 + $0x28] sm:$0xff]  }
  0x26   :  { %270 = vmatprep.subr.bf16.mxu1 %v377_v0  ;;  %286 = vmatprep.mubr.msk.bf16.mxu1 %vm378_vm0, %v377_v0  ;;  %v301_v7 = vld [vmem:[#allocation6 + $0x20] sm:$0xff]   ;;  %v302_v8 = vld [vmem:[#allocation6 + $0x18] sm:$0xff]   ;;  %v303_v9 = vld [vmem:[#allocation6 + $0x10] sm:$0xff]  }
  0x27   :  { %265 = vmatpush3.bf16.msra.mxu0 %v297_v1  ;;  %271 = vmatpush3.bf16.msra.mxu1 %v298_v4  ;;  %v304_v10 = vld [vmem:[#allocation6 + $0x8] sm:$0xff]   ;;  %v305_v11 = vld [vmem:[#allocation6] sm:$0xff]   ;;  %v241_v12 = vld [vmem:[%s429_s2] ss:$0 sm:$0xff] }
  0x28   :  { %272 = vmatprep.subr.bf16.mxu1 %v377_v0  ;;  %v244_v20 = vld [vmem:[%s431_s4] ss:$0 sm:$0xff] }
  0x2a   :  { %267 = vmatmul.mubr.msk.bf16.vlgmr.msra.gmra.mxu0 %vm77_vm1, %v61_v3 }
  0x2b   :  { %273 = vmatpush3.bf16.msra.mxu1 %v299_v5 }
  0x2c   :  { %274 = vmatprep.subr.bf16.mxu1 %v377_v0 }
  0x2f   :  { %275 = vmatpush3.bf16.msra.mxu1 %v300_v6 }
  0x30   :  { %276 = vmatprep.subr.bf16.mxu1 %v377_v0 }
  0x33   :  { %277 = vmatpush3.bf16.msra.mxu1 %v301_v7 }
  0x34   :  { %278 = vmatprep.subr.bf16.mxu1 %v377_v0 }
  0x37   :  { %279 = vmatpush3.bf16.msra.mxu1 %v302_v8 }
  0x38   :  { %280 = vmatprep.subr.bf16.mxu1 %v377_v0 }
  0x3b   :  { %281 = vmatpush3.bf16.msra.mxu1 %v303_v9 }
  0x3c   :  { %282 = vmatprep.subr.bf16.mxu1 %v377_v0 }
  0x3f   :  { %283 = vmatpush3.bf16.msra.mxu1 %v304_v10 }
  0x40   :  { %284 = vmatprep.subr.bf16.mxu1 %v377_v0 }
  0x43   :  { %285 = vmatpush3.bf16.msra.mxu1 %v305_v11 }
  0xea   :  { %v115_v13 = vpop.f32.mrf.mxu0 }
  0xeb   :  { %v116_v14 = vadd.f32 %v241_v12, %v115_v13 }
  0xec   :  { %v268_v15 = vpop.f32.mrf.mxu0 }
  0xed   :  { %v121_v16 = vpack.c.bf16 %v116_v14, %v116_v14 }
  0xee   :  { %v118_v17 = vpop.f32.mrf.mxu0 }
  0xef   :  { %306 = vtanh.bf16 %v121_v16 }
  0xf0   :  { %v269_v18 = vpop.f32.mrf.mxu0 }
  0xfd   :  { %v307_v19 = vpop.eup %306 }
  0xfe   :  { %287 = vmatmul.mubr.bf16.vlgmr.msra.gmra.mxu1 %v307_v19 }
 0x1be   :  { %v228_v21 = vpop.f32.mrf.mxu1 }
 0x1bf   :  { %v229_v22 = vadd.f32 %v244_v20, %v228_v21 }
 0x1c0   :  { %v288_v23 = vpop.f32.mrf.mxu1 }
 0x1c1   :  { %234 = vst [vmem:[%s432_s5] sm:$0xff] %v229_v22 }
 0x1c2   :  { %v231_v24 = vpop.f32.mrf.mxu1 }
 0x1c4   :  { %v289_v25 = vpop.f32.mrf.mxu1 }
 0x1c5   :  { %239 = vsyncpa [#allocation3], 1 }
 0x1c6   :  { %240 = vsyncpa [#allocation5], 1 }

</bundles_post_ra>
